<compile_context>
chip_gen: v6e
topology: v6e:2x2x1
jax: 0.10.0
libtpu: 0.0.40
codegen_flags: <defaults>
</compile_context>

<pallas_src>
import functools
import math

import jax
import jax.numpy as jnp
from jax.experimental import pallas as pl
from jax.experimental.pallas import tpu as pltpu

LANES = 128  # TPU lane width; batch is mapped onto lanes (and sublanes).

# Offsets into the flat packed parameter vector (f32[51]).
# Weights stored PyTorch-style (out, in), row-major.
W1_OFF, B1_OFF = 0, 10      # w1: (5, 2) -> 10, b1: 5
W2_OFF, B2_OFF = 15, 40     # w2: (5, 5) -> 25, b2: 5
W3_OFF, B3_OFF = 45, 50     # w3: (1, 5) ->  5, b3: 1
N_PARAMS = 51

# Per-sample VPU op / HBM byte counts (for the cost estimate).
FLOPS_PER_SAMPLE = 91


def mlp_kernel(p_ref, x_ref, o_ref, *, compute_dtype):
    """p_ref: SMEM f32[51]; x_ref: VMEM (2, sub_tile, 128); o_ref: VMEM (1, sub_tile, 128)."""

    def layer(rows_in, n_in, n_out, w_off, b_off):
        # Fully unrolled scalar*vector FMAs on the VPU; ReLU fused.
        rows_out = []
        for j in range(n_out):
            acc = rows_in[0] * p_ref[w_off + j * n_in].astype(compute_dtype)
            for k in range(1, n_in):
                acc = acc + rows_in[k] * p_ref[w_off + j * n_in + k].astype(compute_dtype)
            acc = acc + p_ref[b_off + j].astype(compute_dtype)
            rows_out.append(jnp.maximum(acc, jnp.zeros((), compute_dtype)))
        return rows_out

    # Whole-block temporaries: ~13 live (sub_tile/8)-deep vreg rows per 8-row chunk; the LLO
    # scheduler keeps this VALU-bound (verified structure unchanged from the prior version).
    x_rows = [x_ref[k].astype(compute_dtype) for k in range(2)]   # each (sub_tile, 128)
    h1 = layer(x_rows, 2, 5, W1_OFF, B1_OFF)                      # 5 x (sub_tile, 128)
    h2 = layer(h1, 5, 5, W2_OFF, B2_OFF)                          # 5 x (sub_tile, 128)
    h3 = layer(h2, 5, 1, W3_OFF, B3_OFF)                          # 1 x (sub_tile, 128)
    o_ref[0] = h3[0].astype(o_ref.dtype)                          # lane-dense, unmasked store


def _round_up(a, m):
    return ((a + m - 1) // m) * m


def _cdiv(a, b):
    return -(-a // b)


def neural_network_forward(x, packed_params, *, max_sub_tile=2048,
                           compute_dtype=jnp.float32):
    """x: (B, 2) float32. Returns (B, 1) float32 = relu(l3(relu(l2(relu(l1(x))))))."""
    B = x.shape[0]

    # Batch -> (sublane, lane) layout: sample b sits at (b // 128, b % 128).
    n_sub = max(8, _round_up(_cdiv(B, LANES), 8))        # sublane rows needed, multiple of 8
    sub_tile = min(max_sub_tile, n_sub)
    # Keep the grid >= 2 steps whenever there is enough work so that
    # dimension_semantics=("parallel",) can shard steps across v7x's two TensorCores.
    if n_sub >= 16:
        sub_tile = min(sub_tile, _round_up(_cdiv(n_sub, 2), 8))
    n_sub = _round_up(n_sub, sub_tile)                   # make the grid divide evenly
    b_pad = n_sub * LANES
    grid = (n_sub // sub_tile,)

    # Input dtype: keep f32 by default (v5e-safe, tight numerics). When the caller opts into the
    # bf16 compute path (v6e/v7x), store the staged input in bf16 too, halving input HBM bytes.
    in_dtype = jnp.float32 if compute_dtype == jnp.float32 else jnp.bfloat16

    # Single fused transpose + pad (no zeros-buffer + scatter), folded into (2, n_sub, 128).
    xt = jnp.pad(x.T.astype(in_dtype), ((0, 0), (0, b_pad - B)))
    xt = xt.reshape(2, n_sub, LANES)

    bytes_per_sample = 2 * jnp.dtype(in_dtype).itemsize + 4   # 2 inputs + 1 f32 output
    cost = pl.CostEstimate(flops=FLOPS_PER_SAMPLE * b_pad,
                           transcendentals=0,
                           bytes_accessed=bytes_per_sample * b_pad)

    out = pl.pallas_call(
        functools.partial(mlp_kernel, compute_dtype=compute_dtype),
        out_shape=jax.ShapeDtypeStruct((1, n_sub, LANES), jnp.float32),
        grid=grid,
        in_specs=[
            # Single packed parameter vector, resident in SMEM across all grid steps.
            pl.BlockSpec(memory_space=pltpu.MemorySpace.SMEM),
            # Batch tile: lane/sublane dense, double-buffered by the Pallas pipeline.
            pl.BlockSpec((2, sub_tile, LANES), lambda i: (0, i, 0)),
        ],
        out_specs=pl.BlockSpec((1, sub_tile, LANES), lambda i: (0, i, 0)),
        compiler_params=pltpu.CompilerParams(
            dimension_semantics=("parallel",),   # lets v7x split the batch across its 2 TCs
        ),
        cost_estimate=cost,
    )(packed_params, xt)

    return out.reshape(b_pad)[:B].reshape(B, 1)


def init_params(key):
    """PyTorch nn.Linear default init: U[-1/sqrt(fan_in), 1/sqrt(fan_in)], weight shape (out, in)."""
    def linear_init(k, fan_in, fan_out):
        kw, kb = jax.random.split(k)
        bound = 1.0 / math.sqrt(fan_in)
        w = jax.random.uniform(kw, (fan_out, fan_in), jnp.float32, -bound, bound)
        b = jax.random.uniform(kb, (fan_out,), jnp.float32, -bound, bound)
        return w, b

    k1, k2, k3 = jax.random.split(key, 3)
    w1, b1 = linear_init(k1, 2, 5)
    w2, b2 = linear_init(k2, 5, 5)
    w3, b3 = linear_init(k3, 5, 1)
    return w1, b1, w2, b2, w3, b3


def pack_params(params):
    w1, b1, w2, b2, w3, b3 = params
    flat = jnp.concatenate([
        w1.reshape(-1), b1.reshape(-1),
        w2.reshape(-1), b2.reshape(-1),
        w3.reshape(-1), b3.reshape(-1),
    ]).astype(jnp.float32)
    assert flat.shape[0] == N_PARAMS
    return flat


def _reference(x, params):
    w1, b1, w2, b2, w3, b3 = params
    h = jnp.maximum(x @ w1.T + b1, 0.0)
    h = jnp.maximum(h @ w2.T + b2, 0.0)
    return jnp.maximum(h @ w3.T + b3, 0.0)


if __name__ == "__main__":
    key = jax.random.PRNGKey(0)
    kx, kp, kx2, kx3 = jax.random.split(key, 4)

    params = init_params(kp)
    packed = pack_params(params)

    # Small-batch check (matches the module's expected usage; grid = 1 block).
    B = 8
    x = jax.random.normal(kx, (B, 2), dtype=jnp.float32)
    out = neural_network_forward(x, packed)
    jax.block_until_ready(out)
    ref = _reference(x, params)
    assert out.shape == (B, 1)
    assert jnp.allclose(out, ref, rtol=1e-5, atol=1e-6), "mismatch vs reference (B=8)"

    # Larger batch with a small tile to exercise the multi-step batch grid / index maps.
    B2 = 2048
    x2 = jax.random.normal(kx2, (B2, 2), dtype=jnp.float32)
    out2 = neural_network_forward(x2, packed, max_sub_tile=8)
    jax.block_until_ready(out2)
    ref2 = _reference(x2, params)
    assert out2.shape == (B2, 1)
    assert jnp.allclose(out2, ref2, rtol=1e-5, atol=1e-6), "mismatch vs reference (B=2048)"

    # Optional packed-bf16 VALU path (main perf lever on v6e/v7x); looser tolerance for bf16.
    B3 = 4096
    x3 = jax.random.normal(kx3, (B3, 2), dtype=jnp.float32)
    out3 = neural_network_forward(x3, packed, compute_dtype=jnp.bfloat16)
    jax.block_until_ready(out3)
    ref3 = _reference(x3, params)
    assert out3.shape == (B3, 1)
    assert jnp.allclose(out3, ref3, rtol=5e-2, atol=5e-2), "mismatch vs reference (bf16 path)"

    print("KERNEL_OK")
</pallas_src>

<mosaic_0001>
module attributes {stable_mosaic.version = 11 : i64} {
  func.func @mlp_kernel(%arg0: i32, %arg1: memref<51xf32, #tpu.memory_space<smem>>, %arg2: memref<2x8x128xf32, #tpu.memory_space<vmem>>, %arg3: memref<1x8x128xf32, #tpu.memory_space<vmem>>) attributes {dimension_semantics = [#tpu.dimension_semantics<parallel>], iteration_bounds = array<i64: 1>, scalar_prefetch = 0 : i64, scratch_operands = 0 : i64, tpu.core_type = #tpu.core_type<tc>, window_params = [{transform_indices = @transform_0, window_bounds = array<i64: 51>}, {transform_indices = @transform_1, window_bounds = array<i64: 2, 8, 128>}, {transform_indices = @transform_2, window_bounds = array<i64: 1, 8, 128>}]} {
    %c0 = arith.constant 0 : index
    %c0_0 = arith.constant 0 : index
    %c0_1 = arith.constant 0 : index
    %0 = vector.load %arg2[%c0, %c0_0, %c0_1] : memref<2x8x128xf32, #tpu.memory_space<vmem>>, vector<1x8x128xf32>
    %1 = vector.shape_cast %0 : vector<1x8x128xf32> to vector<8x128xf32>
    %c1 = arith.constant 1 : index
    %c0_2 = arith.constant 0 : index
    %c0_3 = arith.constant 0 : index
    %2 = vector.load %arg2[%c1, %c0_2, %c0_3] : memref<2x8x128xf32, #tpu.memory_space<vmem>>, vector<1x8x128xf32>
    %3 = vector.shape_cast %2 : vector<1x8x128xf32> to vector<8x128xf32>
    %c0_4 = arith.constant 0 : index
    %4 = memref.load %arg1[%c0_4] : memref<51xf32, #tpu.memory_space<smem>>
    %5 = vector.broadcast %4 : f32 to vector<8x128xf32>
    %6 = arith.mulf %1, %5 : vector<8x128xf32>
    %c1_5 = arith.constant 1 : index
    %7 = memref.load %arg1[%c1_5] : memref<51xf32, #tpu.memory_space<smem>>
    %8 = vector.broadcast %7 : f32 to vector<8x128xf32>
    %9 = arith.mulf %3, %8 : vector<8x128xf32>
    %10 = arith.addf %6, %9 : vector<8x128xf32>
    %c10 = arith.constant 10 : index
    %11 = memref.load %arg1[%c10] : memref<51xf32, #tpu.memory_space<smem>>
    %12 = vector.broadcast %11 : f32 to vector<8x128xf32>
    %13 = arith.addf %10, %12 : vector<8x128xf32>
    %cst = arith.constant 0.000000e+00 : f32
    %14 = vector.broadcast %cst : f32 to vector<8x128xf32>
    %15 = arith.maximumf %13, %14 : vector<8x128xf32>
    %c2 = arith.constant 2 : index
    %16 = memref.load %arg1[%c2] : memref<51xf32, #tpu.memory_space<smem>>
    %17 = vector.broadcast %16 : f32 to vector<8x128xf32>
    %18 = arith.mulf %1, %17 : vector<8x128xf32>
    %c3 = arith.constant 3 : index
    %19 = memref.load %arg1[%c3] : memref<51xf32, #tpu.memory_space<smem>>
    %20 = vector.broadcast %19 : f32 to vector<8x128xf32>
    %21 = arith.mulf %3, %20 : vector<8x128xf32>
    %22 = arith.addf %18, %21 : vector<8x128xf32>
    %c11 = arith.constant 11 : index
    %23 = memref.load %arg1[%c11] : memref<51xf32, #tpu.memory_space<smem>>
    %24 = vector.broadcast %23 : f32 to vector<8x128xf32>
    %25 = arith.addf %22, %24 : vector<8x128xf32>
    %cst_6 = arith.constant 0.000000e+00 : f32
    %26 = vector.broadcast %cst_6 : f32 to vector<8x128xf32>
    %27 = arith.maximumf %25, %26 : vector<8x128xf32>
    %c4 = arith.constant 4 : index
    %28 = memref.load %arg1[%c4] : memref<51xf32, #tpu.memory_space<smem>>
    %29 = vector.broadcast %28 : f32 to vector<8x128xf32>
    %30 = arith.mulf %1, %29 : vector<8x128xf32>
    %c5 = arith.constant 5 : index
    %31 = memref.load %arg1[%c5] : memref<51xf32, #tpu.memory_space<smem>>
    %32 = vector.broadcast %31 : f32 to vector<8x128xf32>
    %33 = arith.mulf %3, %32 : vector<8x128xf32>
    %34 = arith.addf %30, %33 : vector<8x128xf32>
    %c12 = arith.constant 12 : index
    %35 = memref.load %arg1[%c12] : memref<51xf32, #tpu.memory_space<smem>>
    %36 = vector.broadcast %35 : f32 to vector<8x128xf32>
    %37 = arith.addf %34, %36 : vector<8x128xf32>
    %cst_7 = arith.constant 0.000000e+00 : f32
    %38 = vector.broadcast %cst_7 : f32 to vector<8x128xf32>
    %39 = arith.maximumf %37, %38 : vector<8x128xf32>
    %c6 = arith.constant 6 : index
    %40 = memref.load %arg1[%c6] : memref<51xf32, #tpu.memory_space<smem>>
    %41 = vector.broadcast %40 : f32 to vector<8x128xf32>
    %42 = arith.mulf %1, %41 : vector<8x128xf32>
    %c7 = arith.constant 7 : index
    %43 = memref.load %arg1[%c7] : memref<51xf32, #tpu.memory_space<smem>>
    %44 = vector.broadcast %43 : f32 to vector<8x128xf32>
    %45 = arith.mulf %3, %44 : vector<8x128xf32>
    %46 = arith.addf %42, %45 : vector<8x128xf32>
    %c13 = arith.constant 13 : index
    %47 = memref.load %arg1[%c13] : memref<51xf32, #tpu.memory_space<smem>>
    %48 = vector.broadcast %47 : f32 to vector<8x128xf32>
    %49 = arith.addf %46, %48 : vector<8x128xf32>
    %cst_8 = arith.constant 0.000000e+00 : f32
    %50 = vector.broadcast %cst_8 : f32 to vector<8x128xf32>
    %51 = arith.maximumf %49, %50 : vector<8x128xf32>
    %c8 = arith.constant 8 : index
    %52 = memref.load %arg1[%c8] : memref<51xf32, #tpu.memory_space<smem>>
    %53 = vector.broadcast %52 : f32 to vector<8x128xf32>
    %54 = arith.mulf %1, %53 : vector<8x128xf32>
    %c9 = arith.constant 9 : index
    %55 = memref.load %arg1[%c9] : memref<51xf32, #tpu.memory_space<smem>>
    %56 = vector.broadcast %55 : f32 to vector<8x128xf32>
    %57 = arith.mulf %3, %56 : vector<8x128xf32>
    %58 = arith.addf %54, %57 : vector<8x128xf32>
    %c14 = arith.constant 14 : index
    %59 = memref.load %arg1[%c14] : memref<51xf32, #tpu.memory_space<smem>>
    %60 = vector.broadcast %59 : f32 to vector<8x128xf32>
    %61 = arith.addf %58, %60 : vector<8x128xf32>
    %cst_9 = arith.constant 0.000000e+00 : f32
    %62 = vector.broadcast %cst_9 : f32 to vector<8x128xf32>
    %63 = arith.maximumf %61, %62 : vector<8x128xf32>
    %c15 = arith.constant 15 : index
    %64 = memref.load %arg1[%c15] : memref<51xf32, #tpu.memory_space<smem>>
    %65 = vector.broadcast %64 : f32 to vector<8x128xf32>
    %66 = arith.mulf %15, %65 : vector<8x128xf32>
    %c16 = arith.constant 16 : index
    %67 = memref.load %arg1[%c16] : memref<51xf32, #tpu.memory_space<smem>>
    %68 = vector.broadcast %67 : f32 to vector<8x128xf32>
    %69 = arith.mulf %27, %68 : vector<8x128xf32>
    %70 = arith.addf %66, %69 : vector<8x128xf32>
    %c17 = arith.constant 17 : index
    %71 = memref.load %arg1[%c17] : memref<51xf32, #tpu.memory_space<smem>>
    %72 = vector.broadcast %71 : f32 to vector<8x128xf32>
    %73 = arith.mulf %39, %72 : vector<8x128xf32>
    %74 = arith.addf %70, %73 : vector<8x128xf32>
    %c18 = arith.constant 18 : index
    %75 = memref.load %arg1[%c18] : memref<51xf32, #tpu.memory_space<smem>>
    %76 = vector.broadcast %75 : f32 to vector<8x128xf32>
    %77 = arith.mulf %51, %76 : vector<8x128xf32>
    %78 = arith.addf %74, %77 : vector<8x128xf32>
    %c19 = arith.constant 19 : index
    %79 = memref.load %arg1[%c19] : memref<51xf32, #tpu.memory_space<smem>>
    %80 = vector.broadcast %79 : f32 to vector<8x128xf32>
    %81 = arith.mulf %63, %80 : vector<8x128xf32>
    %82 = arith.addf %78, %81 : vector<8x128xf32>
    %c40 = arith.constant 40 : index
    %83 = memref.load %arg1[%c40] : memref<51xf32, #tpu.memory_space<smem>>
    %84 = vector.broadcast %83 : f32 to vector<8x128xf32>
    %85 = arith.addf %82, %84 : vector<8x128xf32>
    %cst_10 = arith.constant 0.000000e+00 : f32
    %86 = vector.broadcast %cst_10 : f32 to vector<8x128xf32>
    %87 = arith.maximumf %85, %86 : vector<8x128xf32>
    %c20 = arith.constant 20 : index
    %88 = memref.load %arg1[%c20] : memref<51xf32, #tpu.memory_space<smem>>
    %89 = vector.broadcast %88 : f32 to vector<8x128xf32>
    %90 = arith.mulf %15, %89 : vector<8x128xf32>
    %c21 = arith.constant 21 : index
    %91 = memref.load %arg1[%c21] : memref<51xf32, #tpu.memory_space<smem>>
    %92 = vector.broadcast %91 : f32 to vector<8x128xf32>
    %93 = arith.mulf %27, %92 : vector<8x128xf32>
    %94 = arith.addf %90, %93 : vector<8x128xf32>
    %c22 = arith.constant 22 : index
    %95 = memref.load %arg1[%c22] : memref<51xf32, #tpu.memory_space<smem>>
    %96 = vector.broadcast %95 : f32 to vector<8x128xf32>
    %97 = arith.mulf %39, %96 : vector<8x128xf32>
    %98 = arith.addf %94, %97 : vector<8x128xf32>
    %c23 = arith.constant 23 : index
    %99 = memref.load %arg1[%c23] : memref<51xf32, #tpu.memory_space<smem>>
    %100 = vector.broadcast %99 : f32 to vector<8x128xf32>
    %101 = arith.mulf %51, %100 : vector<8x128xf32>
    %102 = arith.addf %98, %101 : vector<8x128xf32>
    %c24 = arith.constant 24 : index
    %103 = memref.load %arg1[%c24] : memref<51xf32, #tpu.memory_space<smem>>
    %104 = vector.broadcast %103 : f32 to vector<8x128xf32>
    %105 = arith.mulf %63, %104 : vector<8x128xf32>
    %106 = arith.addf %102, %105 : vector<8x128xf32>
    %c41 = arith.constant 41 : index
    %107 = memref.load %arg1[%c41] : memref<51xf32, #tpu.memory_space<smem>>
    %108 = vector.broadcast %107 : f32 to vector<8x128xf32>
    %109 = arith.addf %106, %108 : vector<8x128xf32>
    %cst_11 = arith.constant 0.000000e+00 : f32
    %110 = vector.broadcast %cst_11 : f32 to vector<8x128xf32>
    %111 = arith.maximumf %109, %110 : vector<8x128xf32>
    %c25 = arith.constant 25 : index
    %112 = memref.load %arg1[%c25] : memref<51xf32, #tpu.memory_space<smem>>
    %113 = vector.broadcast %112 : f32 to vector<8x128xf32>
    %114 = arith.mulf %15, %113 : vector<8x128xf32>
    %c26 = arith.constant 26 : index
    %115 = memref.load %arg1[%c26] : memref<51xf32, #tpu.memory_space<smem>>
    %116 = vector.broadcast %115 : f32 to vector<8x128xf32>
    %117 = arith.mulf %27, %116 : vector<8x128xf32>
    %118 = arith.addf %114, %117 : vector<8x128xf32>
    %c27 = arith.constant 27 : index
    %119 = memref.load %arg1[%c27] : memref<51xf32, #tpu.memory_space<smem>>
    %120 = vector.broadcast %119 : f32 to vector<8x128xf32>
    %121 = arith.mulf %39, %120 : vector<8x128xf32>
    %122 = arith.addf %118, %121 : vector<8x128xf32>
    %c28 = arith.constant 28 : index
    %123 = memref.load %arg1[%c28] : memref<51xf32, #tpu.memory_space<smem>>
    %124 = vector.broadcast %123 : f32 to vector<8x128xf32>
    %125 = arith.mulf %51, %124 : vector<8x128xf32>
    %126 = arith.addf %122, %125 : vector<8x128xf32>
    %c29 = arith.constant 29 : index
    %127 = memref.load %arg1[%c29] : memref<51xf32, #tpu.memory_space<smem>>
    %128 = vector.broadcast %127 : f32 to vector<8x128xf32>
    %129 = arith.mulf %63, %128 : vector<8x128xf32>
    %130 = arith.addf %126, %129 : vector<8x128xf32>
    %c42 = arith.constant 42 : index
    %131 = memref.load %arg1[%c42] : memref<51xf32, #tpu.memory_space<smem>>
    %132 = vector.broadcast %131 : f32 to vector<8x128xf32>
    %133 = arith.addf %130, %132 : vector<8x128xf32>
    %cst_12 = arith.constant 0.000000e+00 : f32
    %134 = vector.broadcast %cst_12 : f32 to vector<8x128xf32>
    %135 = arith.maximumf %133, %134 : vector<8x128xf32>
    %c30 = arith.constant 30 : index
    %136 = memref.load %arg1[%c30] : memref<51xf32, #tpu.memory_space<smem>>
    %137 = vector.broadcast %136 : f32 to vector<8x128xf32>
    %138 = arith.mulf %15, %137 : vector<8x128xf32>
    %c31 = arith.constant 31 : index
    %139 = memref.load %arg1[%c31] : memref<51xf32, #tpu.memory_space<smem>>
    %140 = vector.broadcast %139 : f32 to vector<8x128xf32>
    %141 = arith.mulf %27, %140 : vector<8x128xf32>
    %142 = arith.addf %138, %141 : vector<8x128xf32>
    %c32 = arith.constant 32 : index
    %143 = memref.load %arg1[%c32] : memref<51xf32, #tpu.memory_space<smem>>
    %144 = vector.broadcast %143 : f32 to vector<8x128xf32>
    %145 = arith.mulf %39, %144 : vector<8x128xf32>
    %146 = arith.addf %142, %145 : vector<8x128xf32>
    %c33 = arith.constant 33 : index
    %147 = memref.load %arg1[%c33] : memref<51xf32, #tpu.memory_space<smem>>
    %148 = vector.broadcast %147 : f32 to vector<8x128xf32>
    %149 = arith.mulf %51, %148 : vector<8x128xf32>
    %150 = arith.addf %146, %149 : vector<8x128xf32>
    %c34 = arith.constant 34 : index
    %151 = memref.load %arg1[%c34] : memref<51xf32, #tpu.memory_space<smem>>
    %152 = vector.broadcast %151 : f32 to vector<8x128xf32>
    %153 = arith.mulf %63, %152 : vector<8x128xf32>
    %154 = arith.addf %150, %153 : vector<8x128xf32>
    %c43 = arith.constant 43 : index
    %155 = memref.load %arg1[%c43] : memref<51xf32, #tpu.memory_space<smem>>
    %156 = vector.broadcast %155 : f32 to vector<8x128xf32>
    %157 = arith.addf %154, %156 : vector<8x128xf32>
    %cst_13 = arith.constant 0.000000e+00 : f32
    %158 = vector.broadcast %cst_13 : f32 to vector<8x128xf32>
    %159 = arith.maximumf %157, %158 : vector<8x128xf32>
    %c35 = arith.constant 35 : index
    %160 = memref.load %arg1[%c35] : memref<51xf32, #tpu.memory_space<smem>>
    %161 = vector.broadcast %160 : f32 to vector<8x128xf32>
    %162 = arith.mulf %15, %161 : vector<8x128xf32>
    %c36 = arith.constant 36 : index
    %163 = memref.load %arg1[%c36] : memref<51xf32, #tpu.memory_space<smem>>
    %164 = vector.broadcast %163 : f32 to vector<8x128xf32>
    %165 = arith.mulf %27, %164 : vector<8x128xf32>
    %166 = arith.addf %162, %165 : vector<8x128xf32>
    %c37 = arith.constant 37 : index
    %167 = memref.load %arg1[%c37] : memref<51xf32, #tpu.memory_space<smem>>
    %168 = vector.broadcast %167 : f32 to vector<8x128xf32>
    %169 = arith.mulf %39, %168 : vector<8x128xf32>
    %170 = arith.addf %166, %169 : vector<8x128xf32>
    %c38 = arith.constant 38 : index
    %171 = memref.load %arg1[%c38] : memref<51xf32, #tpu.memory_space<smem>>
    %172 = vector.broadcast %171 : f32 to vector<8x128xf32>
    %173 = arith.mulf %51, %172 : vector<8x128xf32>
    %174 = arith.addf %170, %173 : vector<8x128xf32>
    %c39 = arith.constant 39 : index
    %175 = memref.load %arg1[%c39] : memref<51xf32, #tpu.memory_space<smem>>
    %176 = vector.broadcast %175 : f32 to vector<8x128xf32>
    %177 = arith.mulf %63, %176 : vector<8x128xf32>
    %178 = arith.addf %174, %177 : vector<8x128xf32>
    %c44 = arith.constant 44 : index
    %179 = memref.load %arg1[%c44] : memref<51xf32, #tpu.memory_space<smem>>
    %180 = vector.broadcast %179 : f32 to vector<8x128xf32>
    %181 = arith.addf %178, %180 : vector<8x128xf32>
    %cst_14 = arith.constant 0.000000e+00 : f32
    %182 = vector.broadcast %cst_14 : f32 to vector<8x128xf32>
    %183 = arith.maximumf %181, %182 : vector<8x128xf32>
    %c45 = arith.constant 45 : index
    %184 = memref.load %arg1[%c45] : memref<51xf32, #tpu.memory_space<smem>>
    %185 = vector.broadcast %184 : f32 to vector<8x128xf32>
    %186 = arith.mulf %87, %185 : vector<8x128xf32>
    %c46 = arith.constant 46 : index
    %187 = memref.load %arg1[%c46] : memref<51xf32, #tpu.memory_space<smem>>
    %188 = vector.broadcast %187 : f32 to vector<8x128xf32>
    %189 = arith.mulf %111, %188 : vector<8x128xf32>
    %190 = arith.addf %186, %189 : vector<8x128xf32>
    %c47 = arith.constant 47 : index
    %191 = memref.load %arg1[%c47] : memref<51xf32, #tpu.memory_space<smem>>
    %192 = vector.broadcast %191 : f32 to vector<8x128xf32>
    %193 = arith.mulf %135, %192 : vector<8x128xf32>
    %194 = arith.addf %190, %193 : vector<8x128xf32>
    %c48 = arith.constant 48 : index
    %195 = memref.load %arg1[%c48] : memref<51xf32, #tpu.memory_space<smem>>
    %196 = vector.broadcast %195 : f32 to vector<8x128xf32>
    %197 = arith.mulf %159, %196 : vector<8x128xf32>
    %198 = arith.addf %194, %197 : vector<8x128xf32>
    %c49 = arith.constant 49 : index
    %199 = memref.load %arg1[%c49] : memref<51xf32, #tpu.memory_space<smem>>
    %200 = vector.broadcast %199 : f32 to vector<8x128xf32>
    %201 = arith.mulf %183, %200 : vector<8x128xf32>
    %202 = arith.addf %198, %201 : vector<8x128xf32>
    %c50 = arith.constant 50 : index
    %203 = memref.load %arg1[%c50] : memref<51xf32, #tpu.memory_space<smem>>
    %204 = vector.broadcast %203 : f32 to vector<8x128xf32>
    %205 = arith.addf %202, %204 : vector<8x128xf32>
    %cst_15 = arith.constant 0.000000e+00 : f32
    %206 = vector.broadcast %cst_15 : f32 to vector<8x128xf32>
    %207 = arith.maximumf %205, %206 : vector<8x128xf32>
    %c0_16 = arith.constant 0 : index
    %c0_17 = arith.constant 0 : index
    %c0_18 = arith.constant 0 : index
    %208 = vector.load %arg3[%c0_16, %c0_17, %c0_18] : memref<1x8x128xf32, #tpu.memory_space<vmem>>, vector<1x8x128xf32>
    %209 = vector.shape_cast %208 : vector<1x8x128xf32> to vector<8x128xf32>
    %210 = vector.shape_cast %207 : vector<8x128xf32> to vector<1x8x128xf32>
    tpu.vector_store %arg3[%c0_16, %c0_17, %c0_18], %210 {strides = array<i32>} : memref<1x8x128xf32, #tpu.memory_space<vmem>>, vector<1x8x128xf32>,
    return
  }
  func.func @transform_0(%arg0: i32) -> i32 {
    %c0_i32 = arith.constant 0 : i32
    %c0_i32_0 = arith.constant 0 : i32
    return %c0_i32 : i32
  }
  func.func @transform_1(%arg0: i32) -> (i32, i32, i32) {
    %c0_i32 = arith.constant 0 : i32
    %c0_i32_0 = arith.constant 0 : i32
    %c0_i32_1 = arith.constant 0 : i32
    return %c0_i32, %arg0, %c0_i32_0 : i32, i32, i32
  }
  func.func @transform_2(%arg0: i32) -> (i32, i32, i32) {
    %c0_i32 = arith.constant 0 : i32
    %c0_i32_0 = arith.constant 0 : i32
    %c0_i32_1 = arith.constant 0 : i32
    return %c0_i32, %arg0, %c0_i32_0 : i32, i32, i32
  }
}

</mosaic_0001>

<bundles_post_ra>
// kernel: tpu_custom_call.1
= control target key start
LH: loop header
LB: loop body
LE: loop exit
PB: predicated region body
PF: predicated region fallthrough
CT: control target
= control target key end

     0   :  { %7 = vsyncpa [#allocation5], 0  ;;  %s456_s0 = inlined_call_operand.hbm [shape: f32[51], index: 0, kind: input, shape index: {}]   ;;  %s457_s1 = inlined_call_operand.hbm [shape: f32[2,8,128], index: 1, kind: input, shape index: {}]   ;;  %s458_s2 = inlined_call_operand.hbm [shape: f32[1,8,128], index: 2, kind: output, shape index: {}]  }
   0x1   :  { %8 = vsyncpa [#allocation3], 0 }
   0x2   :  { %9 = vsyncpa [#allocation4], 0  ;;  %s359_s9 = smov [#allocation2]   ;;  %s360_s12 = smov [#allocation6]  }
   0x3   :  { %17 = dma.hbm_to_smem %s456_s0, 16, %s359_s9, [#allocation5]  }
   0x4   :  { %s23_s13 = sshll.u32 %s360_s12, 4  ;;  %s24_s13 = int_to_ptr.vmem [resolvable:$true] %s23_s13 }
   0x5   :  { %s321_s14 = scalar_lea.vmem %s24_s13, 256  ;;  %p326_p1 = scmp.lt.s32.totalorder %s24_s13, %s24_s13 }
   0x6   :  { %p322_p0 = scmp.ne.s32.totalorder %s24_s13, %s321_s14  ;;  %p327_p2 = scmp.lt.s32.totalorder %s321_s14, %s321_s14 }
   0x8   :  { %p328_p3 = por %p327_p2, %p326_p1 }
   0xa   :  { %p329_p4 = pnand %p328_p3, %p322_p0 }
   0xc   :  { %332 = shalt.err (!%p329_p4)
}
   0xd   :  { %s361_s15 = smov 128   ;;  %s362_s16 = smov 8  }
   0xe   :  { %29 = dma.hbm_to_vmem [thread:$0]  %s457_s1, 256, %s24_s13, [#allocation3], %s361_s15, %s361_s15, %s362_s16  }
   0xf   :  { %353 = dma.done.wait [#allocation5], 16  }
  0x10   :  { %354 = vsyncadd [#allocation5], 4294967280 }
  0x11   :  { %355 = dma.done.wait [#allocation3], 256  }
  0x12   :  { %356 = vsyncadd [#allocation3], 4294967040 }
  0x13   :  { %36 = sfence }
  0x14   :  { %s40_s0 = sld [smem:[#allocation2]]  ;;  %v37_v0 = vld [vmem:[#allocation6] sm:$0xff]  ;;  %v39_v1 = vld [vmem:[#allocation6 + $0x8] sm:$0xff] }
  0x15   :  { %s250_s19 = sld [smem:[#allocation2 + $0x1]] }
  0x16   :  { %s251_s20 = sld [smem:[#allocation2 + $0xa]] }
  0x17   :  { %s252_s21 = sld [smem:[#allocation2 + $0x2]] }
  0x18   :  { %s253_s22 = sld [smem:[#allocation2 + $0x3]] }
  0x19   :  { %s254_s23 = sld [smem:[#allocation2 + $0xb]] }
  0x1a   :  { %v41_v2 = vstv %s40_s0  ;;  %s255_s24 = sld [smem:[#allocation2 + $0x4]] }
  0x1b   :  { %v42_v3 = vmul.f32 %v41_v2, %v37_v0  ;;  %v44_v4 = vstv %s250_s19  ;;  %s256_s25 = sld [smem:[#allocation2 + $0x5]] }
  0x1c   :  { %v45_v5 = vmul.f32 %v44_v4, %v39_v1  ;;  %s385_s1 = sld [smem:[#allocation2 + $0xc]]  ;;  %v48_v10 = vstv %s251_s20 }
  0x1d   :  { %v52_v6 = vstv %s252_s21  ;;  %s258_s26 = sld [smem:[#allocation2 + $0x6]] }
  0x1e   :  { %v46_v7 = vadd.f32 %v45_v5, %v42_v3  ;;  %v53_v8 = vmul.f32 %v52_v6, %v37_v0  ;;  %v55_v9 = vstv %s253_s22  ;;  %s259_s27 = sld [smem:[#allocation2 + $0x7]] }
  0x1f   :  { %v56_v11 = vmul.f32 %v55_v9, %v39_v1  ;;  %s387_s28 = sld [smem:[#allocation2 + $0xd]]  ;;  %v59_v12 = vstv %s254_s23 }
  0x20   :  { %v63_v13 = vstv %s255_s24  ;;  %s261_s29 = sld [smem:[#allocation2 + $0x8]]  ;;  %v49_v17 = vadd.f32 %v48_v10, %v46_v7 }
  0x21   :  { %v57_v14 = vadd.f32 %v56_v11, %v53_v8  ;;  %v64_v15 = vmul.f32 %v63_v13, %v37_v0  ;;  %v66_v16 = vstv %s256_s25  ;;  %s262_s30 = sld [smem:[#allocation2 + $0x9]] }
  0x22   :  { %v67_v18 = vmul.f32 %v66_v16, %v39_v1  ;;  %s389_s3 = sld [smem:[#allocation2 + $0xe]]  ;;  %v70_v20 = vstv %s385_s1  ;;  %v392_v26 = vmax.f32 %v49_v17, 0.0 }
  0x23   :  { %v60_v19 = vadd.f32 %v59_v12, %v57_v14  ;;  %v74_v21 = vstv %s258_s26  ;;  %s264_s4 = sld [smem:[#allocation2 + $0xf]] }
  0x24   :  { %v68_v22 = vadd.f32 %v67_v18, %v64_v15  ;;  %v75_v23 = vmul.f32 %v74_v21, %v37_v0  ;;  %v77_v24 = vstv %s259_s27  ;;  %s265_s5 = sld [smem:[#allocation2 + $0x10]] }
  0x25   :  { %v78_v25 = vmul.f32 %v77_v24, %v39_v1  ;;  %s266_s6 = sld [smem:[#allocation2 + $0x11]]  ;;  %v81_v28 = vstv %s387_s28  ;;  %v397_v30 = vmax.f32 %v60_v19, 0.0 }
  0x26   :  { %v71_v27 = vadd.f32 %v70_v20, %v68_v22  ;;  %v85_v29 = vstv %s261_s29  ;;  %s395_s7 = sld [smem:[#allocation2 + $0x12]] }
  0x27   :  { %v79_v31 = vadd.f32 %v78_v25, %v75_v23  ;;  %v86_v32 = vmul.f32 %v85_v29, %v37_v0  ;;  %v88_v33 = vstv %s262_s30  ;;  %s399_s8 = sld [smem:[#allocation2 + $0x13]] }
  0x28   :  { %v89_v34 = vmul.f32 %v88_v33, %v39_v1  ;;  %s401_s9 = sld [smem:[#allocation2 + $0x28]]  ;;  %v403_v37 = vmax.f32 %v71_v27, 0.0  ;;  %v92_v41 = vstv %s389_s3 }
  0x29   :  { %v82_v35 = vadd.f32 %v81_v28, %v79_v31  ;;  %v96_v36 = vstv %s264_s4  ;;  %s270_s10 = sld [smem:[#allocation2 + $0x14]] }
  0x2a   :  { %v90_v38 = vadd.f32 %v89_v34, %v86_v32  ;;  %v97_v39 = vmul.f32 %v96_v36, %v392_v26  ;;  %v99_v40 = vstv %s265_s5  ;;  %s271_s11 = sld [smem:[#allocation2 + $0x15]] }
  0x2b   :  { %v100_v42 = vmul.f32 %v99_v40, %v397_v30  ;;  %v103_v43 = vstv %s266_s6  ;;  %s272_s12 = sld [smem:[#allocation2 + $0x16]]  ;;  %v408_v44 = vmax.f32 %v82_v35, 0.0 }
  0x2c   :  { %s273_s13 = sld [smem:[#allocation2 + $0x17]]  ;;  %v93_v45 = vadd.f32 %v92_v41, %v90_v38  ;;  %v104_v47 = vmul.f32 %v103_v43, %v403_v37  ;;  %v107_v48 = vstv %s395_s7 }
  0x2d   :  { %s410_s14 = sld [smem:[#allocation2 + $0x18]]  ;;  %v101_v46 = vadd.f32 %v100_v42, %v97_v39  ;;  %v108_v52 = vmul.f32 %v107_v48, %v408_v44  ;;  %v111_v59 = vstv %s399_s8 }
  0x2e   :  { %s414_s15 = sld [smem:[#allocation2 + $0x29]]  ;;  %v419_v55 = vmax.f32 %v93_v45, 0.0  ;;  %v115_v15 = vstv %s401_s9 }
  0x2f   :  { %v119_v49 = vstv %s270_s10  ;;  %s276_s16 = sld [smem:[#allocation2 + $0x19]]  ;;  %v105_v56 = vadd.f32 %v104_v47, %v101_v46  ;;  %s363_s10 = smov [#allocation7]  }
  0x30   :  { %v120_v50 = vmul.f32 %v119_v49, %v392_v26  ;;  %v122_v51 = vstv %s271_s11  ;;  %s277_s17 = sld [smem:[#allocation2 + $0x1a]]  ;;  %v112_v2 = vmul.f32 %v111_v59, %v419_v55  ;;  %s240_s11 = sshll.u32 %s363_s10, 4  ;;  %s241_s11 = int_to_ptr.vmem [resolvable:$true] %s240_s11 }
  0x31   :  { %v123_v53 = vmul.f32 %v122_v51, %v397_v30  ;;  %v126_v54 = vstv %s272_s12  ;;  %s278_s18 = sld [smem:[#allocation2 + $0x1b]]  ;;  %v109_v1 = vadd.f32 %v108_v52, %v105_v56  ;;  %s333_s12 = scalar_lea.vmem %s241_s11, 128 }
  0x32   :  { %v127_v57 = vmul.f32 %v126_v54, %v403_v37  ;;  %v130_v58 = vstv %s273_s13  ;;  %s279_s0 = sld [smem:[#allocation2 + $0x1c]]  ;;  %p334_p5 = scmp.ne.s32.totalorder %s241_s11, %s333_s12 }
  0x33   :  { %v124_v60 = vadd.f32 %v123_v53, %v120_v50  ;;  %s280_s19 = sld [smem:[#allocation2 + $0x1d]]  ;;  %v131_v61 = vmul.f32 %v130_v58, %v408_v44  ;;  %v134_v63 = vstv %s410_s14  ;;  %v113_v14 = vadd.f32 %v112_v2, %v109_v1  ;;  %p338_p6 = scmp.lt.s32.totalorder %s241_s11, %s241_s11 }
  0x34   :  { %s424_s20 = sld [smem:[#allocation2 + $0x2a]]  ;;  %v135_v8 = vmul.f32 %v134_v63, %v419_v55  ;;  %v138_v22 = vstv %s414_s15  ;;  %p339_p7 = scmp.lt.s32.totalorder %s333_s12, %s333_s12 }
  0x35   :  { %v128_v62 = vadd.f32 %v127_v57, %v124_v60  ;;  %v142_v0 = vstv %s276_s16  ;;  %s282_s21 = sld [smem:[#allocation2 + $0x1e]]  ;;  %v116_v27 = vadd.f32 %v115_v15, %v113_v14 }
  0x36   :  { %v143_v3 = vmul.f32 %v142_v0, %v392_v26  ;;  %v145_v4 = vstv %s277_s17  ;;  %s283_s22 = sld [smem:[#allocation2 + $0x1f]]  ;;  %p340_p8 = por %p339_p7, %p338_p6 }
  0x37   :  { %v146_v5 = vmul.f32 %v145_v4, %v397_v30  ;;  %v149_v6 = vstv %s278_s18  ;;  %s284_s23 = sld [smem:[#allocation2 + $0x20]]  ;;  %v132_v7 = vadd.f32 %v131_v61, %v128_v62  ;;  %v117_v45 = vmax.f32 %v116_v27, 0.0 }
  0x38   :  { %v150_v9 = vmul.f32 %v149_v6, %v403_v37  ;;  %v153_v10 = vstv %s279_s0  ;;  %s285_s24 = sld [smem:[#allocation2 + $0x21]]  ;;  %p341_p9 = pnand %p340_p8, %p334_p5 }
  0x39   :  { %v147_v11 = vadd.f32 %v146_v5, %v143_v3  ;;  %v154_v12 = vmul.f32 %v153_v10, %v408_v44  ;;  %v157_v13 = vstv %s280_s19  ;;  %s286_s25 = sld [smem:[#allocation2 + $0x22]]  ;;  %v136_v19 = vadd.f32 %v135_v8, %v132_v7 }
  0x3a   :  { %s433_s1 = sld [smem:[#allocation2 + $0x2b]]  ;;  %v158_v17 = vmul.f32 %v157_v13, %v419_v55  ;;  %v161_v28 = vstv %s424_s20 }
  0x3b   :  { %v151_v16 = vadd.f32 %v150_v9, %v147_v11  ;;  %v165_v18 = vstv %s282_s21  ;;  %s288_s26 = sld [smem:[#allocation2 + $0x23]]  ;;  %v139_v36 = vadd.f32 %v138_v22, %v136_v19 }
  0x3c   :  { %v166_v20 = vmul.f32 %v165_v18, %v392_v26  ;;  %v168_v21 = vstv %s283_s22  ;;  %s289_s27 = sld [smem:[#allocation2 + $0x24]] }
  0x3d   :  { %v155_v23 = vadd.f32 %v154_v12, %v151_v16  ;;  %v169_v24 = vmul.f32 %v168_v21, %v397_v30  ;;  %v172_v25 = vstv %s284_s23  ;;  %s290_s28 = sld [smem:[#allocation2 + $0x25]]  ;;  %v140_v49 = vmax.f32 %v139_v36, 0.0 }
  0x3e   :  { %v173_v29 = vmul.f32 %v172_v25, %v403_v37  ;;  %v176_v31 = vstv %s285_s24  ;;  %s291_s29 = sld [smem:[#allocation2 + $0x26]] }
  0x3f   :  { %v159_v32 = vadd.f32 %v158_v17, %v155_v23  ;;  %v170_v33 = vadd.f32 %v169_v24, %v166_v20  ;;  %v177_v34 = vmul.f32 %v176_v31, %v408_v44  ;;  %v180_v35 = vstv %s286_s25  ;;  %s292_s30 = sld [smem:[#allocation2 + $0x27]] }
  0x40   :  { %s443_s3 = sld [smem:[#allocation2 + $0x2c]]  ;;  %v181_v39 = vmul.f32 %v180_v35, %v419_v55  ;;  %v184_v50 = vstv %s433_s1 }
  0x41   :  { %v174_v38 = vadd.f32 %v173_v29, %v170_v33  ;;  %v188_v40 = vstv %s288_s26  ;;  %s294_s4 = sld [smem:[#allocation2 + $0x2d]]  ;;  %v162_v41 = vadd.f32 %v161_v28, %v159_v32 }
  0x42   :  { %v189_v42 = vmul.f32 %v188_v40, %v392_v26  ;;  %v191_v43 = vstv %s289_s27  ;;  %s295_s5 = sld [smem:[#allocation2 + $0x2e]] }
  0x43   :  { %v178_v46 = vadd.f32 %v177_v34, %v174_v38  ;;  %v192_v47 = vmul.f32 %v191_v43, %v397_v30  ;;  %v195_v48 = vstv %s290_s28  ;;  %s296_s6 = sld [smem:[#allocation2 + $0x2f]]  ;;  %v163_v57 = vmax.f32 %v162_v41, 0.0 }
  0x44   :  { %v196_v51 = vmul.f32 %v195_v48, %v403_v37  ;;  %v199_v52 = vstv %s291_s29  ;;  %s297_s7 = sld [smem:[#allocation2 + $0x30]] }
  0x45   :  { %v182_v53 = vadd.f32 %v181_v39, %v178_v46  ;;  %v193_v54 = vadd.f32 %v192_v47, %v189_v42  ;;  %v200_v56 = vmul.f32 %v199_v52, %v408_v44  ;;  %v203_v26 = vstv %s292_s30  ;;  %s298_s8 = sld [smem:[#allocation2 + $0x31]] }
  0x46   :  { %v204_v30 = vmul.f32 %v203_v26, %v419_v55  ;;  %v207_v2 = vstv %s443_s3  ;;  %s299_s9 = sld [smem:[#allocation2 + $0x32]] }
  0x47   :  { %v185_v58 = vadd.f32 %v184_v50, %v182_v53  ;;  %v197_v59 = vadd.f32 %v196_v51, %v193_v54  ;;  %v211_v60 = vstv %s294_s4 }
  0x48   :  { %v212_v61 = vmul.f32 %v211_v60, %v117_v45  ;;  %v214_v62 = vstv %s295_s5 }
  0x49   :  { %v186_v63 = vmax.f32 %v185_v58, 0.0  ;;  %v201_v0 = vadd.f32 %v200_v56, %v197_v59  ;;  %v215_v37 = vmul.f32 %v214_v62, %v140_v49  ;;  %v218_v1 = vstv %s296_s6 }
  0x4a   :  { %v219_v3 = vmul.f32 %v218_v1, %v163_v57  ;;  %v222_v4 = vstv %s297_s7 }
  0x4b   :  { %v205_v5 = vadd.f32 %v204_v30, %v201_v0  ;;  %v216_v44 = vadd.f32 %v215_v37, %v212_v61  ;;  %v223_v6 = vmul.f32 %v222_v4, %v186_v63  ;;  %v226_v9 = vstv %s298_s8 }
  0x4c   :  { %v230_v12 = vstv %s299_s9 }
  0x4d   :  { %v208_v7 = vadd.f32 %v207_v2, %v205_v5  ;;  %v220_v8 = vadd.f32 %v219_v3, %v216_v44 }
  0x4f   :  { %v209_v10 = vmax.f32 %v208_v7, 0.0  ;;  %v224_v11 = vadd.f32 %v223_v6, %v220_v8 }
  0x51   :  { %v227_v55 = vmul.f32 %v226_v9, %v209_v10 }
  0x53   :  { %v228_v13 = vadd.f32 %v227_v55, %v224_v11 }
  0x55   :  { %v231_v14 = vadd.f32 %v230_v12, %v228_v13 }
  0x57   :  { %v232_v15 = vmax.f32 %v231_v14, 0.0 }
  0x59   :  { %233 = vst [vmem:[#allocation7] sm:$0xff] %v232_v15 }
  0x5a   :  { %344 = shalt.err (!%p341_p9)
}
  0x5b   :  { %243 = dma.vmem_to_hbm [thread:$0]  %s241_s11, 128, %s458_s2, [#allocation4]  }
  0x5c   :  { %357 = dma.done.wait [#allocation4], 128  }
  0x5d   :  { %358 = vsyncadd [#allocation4], 4294967168 }
  0x5e   :  { %247 = vsyncpa [#allocation3], 1 }
  0x5f   :  { %248 = vsyncpa [#allocation4], 1 }
  0x60   :  { %249 = vsyncpa [#allocation5], 1 }

</bundles_post_ra>
